<compile_context>
chip_gen: v7x
topology: tpu7x:2x2x1
jax: 0.10.0
libtpu: 0.0.40
codegen_flags: <defaults>
</compile_context>

<pallas_src>
import jax
import jax.numpy as jnp
from jax.experimental import pallas as pl
from jax.experimental.pallas import tpu as pltpu


def _round_up(x, m):
    return ((x + m - 1) // m) * m


def _cdiv(a, b):
    return (a + b - 1) // b


# ----------------------------------------------------------------------------
# Kernel
# ----------------------------------------------------------------------------
def g_reason_kernel(x_ref, w1_ref, b1_ref, w2_ref, b2_ref, o_ref):
    cdt = w1_ref.dtype  # MXU operand dtype (bf16 or f32), fixed at prepare time
    # Layer 1: cast x in-kernel (free VPU work under a mem-bound regime),
    # MXU matmul with f32 accumulation, bias + ReLU in f32 (VPU).
    h = jnp.dot(x_ref[...].astype(cdt), w1_ref[...],
                preferred_element_type=jnp.float32)
    h = jnp.maximum(h + b1_ref[...], 0.0)
    # Layer 2.
    o = jnp.dot(h.astype(cdt), w2_ref[...], preferred_element_type=jnp.float32)
    o_ref[...] = (o + b2_ref[...]).astype(o_ref.dtype)


# ----------------------------------------------------------------------------
# One-time parameter preparation (outside the per-call path)
# ----------------------------------------------------------------------------
def prepare_params(w1, b1, w2, b2, compute_dtype=jnp.bfloat16):
    """Cast/shape the parameters once.

    w1: [same_dim * num_inputs, same_dim]   (transpose of torch nn.Linear weight)
    w2: [same_dim, same_dim]
    b1, b2: [same_dim] or [1, same_dim]
    """
    w1 = jnp.asarray(w1, compute_dtype)
    w2 = jnp.asarray(w2, compute_dtype)
    b1 = jnp.asarray(b1, jnp.float32).reshape(1, -1)
    b2 = jnp.asarray(b2, jnp.float32).reshape(1, -1)
    return w1, b1, w2, b2


def _vmem_budget_bytes():
    """Generation-aware usable-VMEM budget (leave Mosaic scratch headroom)."""
    try:
        cap = int(pltpu.get_tpu_info().vmem_capacity_bytes)
    except Exception:
        cap = 64 << 20  # assume the smallest generation (v7x) if query fails
    return max(min(cap - (16 << 20), 100 << 20), 16 << 20)


# ----------------------------------------------------------------------------
# Forward
# ----------------------------------------------------------------------------
def g_reason_forward(x, params, *, tile_b=None, single_buffer_weights=True):
    """y = Linear2(relu(Linear1(x))).

    x:      [B, same_dim * num_inputs]  (any float dtype; cast in-kernel)
    params: output of prepare_params()
    returns [B, same_dim] in x.dtype
    """
    w1, b1, w2, b2 = params
    B, in1 = x.shape
    same_dim = w1.shape[1]
    out_dtype = x.dtype
    xb = jnp.dtype(x.dtype).itemsize
    wb = jnp.dtype(w1.dtype).itemsize
    ob = jnp.dtype(out_dtype).itemsize

    # ---- batch tile selection ------------------------------------------
    if tile_b is None:
        tile_b = 1024                       # big tiles amortize ~0.35us/step
    tile_b = max(16, _round_up(min(tile_b, max(B, 1)), 16))  # 16: bf16 sublanes
    if B > 16:
        # keep >= 2 grid steps so ("parallel",) can shard across both v7x TCs
        tile_b = min(tile_b, _round_up(_cdiv(B, 2), 16))

    budget = _vmem_budget_bytes()

    def working_set(tb):
        return (2 * tb * in1 * xb              # x tile (double-buffered)
                + 2 * tb * same_dim * ob       # out tile (double-buffered)
                + tb * in1 * wb                # in-kernel cast copy of x tile
                + 2 * tb * same_dim * 4        # f32 h / o intermediates
                + 2 * (w1.size + w2.size) * wb  # weights (assume 2-buffered)
                + 2 * (b1.size + b2.size) * 4)

    while tile_b > 16 and working_set(tile_b) > budget:
        tile_b = max(16, _round_up(tile_b // 2, 16))
    # TODO(synk): if the resident weights alone exceed the VMEM budget (very
    # large same_dim * num_inputs), add a K grid axis over in1 with an f32
    # accumulator scratch (pl.when init/finalize) instead of a resident W1.

    grid = (_cdiv(B, tile_b),)
    vmem_limit = int(min(budget, max(working_set(tile_b) * 1.25, 32 << 20)))

    cost = pl.CostEstimate(
        flops=2 * B * (in1 * same_dim + same_dim * same_dim),
        transcendentals=0,
        bytes_accessed=(x.size * xb + (w1.size + w2.size) * wb
                        + (b1.size + b2.size) * 4 + B * same_dim * ob),
    )

    def build(single_buffer):
        # Constant-index weight/bias blocks: single-buffer them when supported.
        wkw = dict(pipeline_mode=pl.Buffered(1)) if single_buffer else {}
        return pl.pallas_call(
            g_reason_kernel,
            out_shape=jax.ShapeDtypeStruct((B, same_dim), out_dtype),
            grid_spec=pltpu.PrefetchScalarGridSpec(
                num_scalar_prefetch=0,
                grid=grid,
                in_specs=[
                    pl.BlockSpec((tile_b, in1), lambda i: (i, 0)),          # x
                    pl.BlockSpec((in1, same_dim), lambda i: (0, 0), **wkw),  # W1
                    pl.BlockSpec((1, same_dim), lambda i: (0, 0), **wkw),    # b1
                    pl.BlockSpec((same_dim, same_dim), lambda i: (0, 0), **wkw),  # W2
                    pl.BlockSpec((1, same_dim), lambda i: (0, 0), **wkw),    # b2
                ],
                out_specs=pl.BlockSpec((tile_b, same_dim), lambda i: (i, 0)),
            ),
            compiler_params=pltpu.CompilerParams(
                dimension_semantics=("parallel",),
                vmem_limit_bytes=vmem_limit),
            cost_estimate=cost,
        )

    if single_buffer_weights:
        try:
            return jax.block_until_ready(build(True)(x, w1, b1, w2, b2))
        except Exception:
            # pipeline_mode=Buffered(1) unsupported in this build -> default
            # (double) buffering; correctness is unaffected.
            pass
    return build(False)(x, w1, b1, w2, b2)


# ----------------------------------------------------------------------------
# Reference + synthetic init
# ----------------------------------------------------------------------------
def init_params(key, same_dim, num_inputs, dtype=jnp.float32):
    """Deterministic PyTorch-nn.Linear-style uniform init (synthetic weights)."""
    in1 = same_dim * num_inputs
    k1, k2, k3, k4 = jax.random.split(key, 4)
    bound1 = 1.0 / jnp.sqrt(in1)
    bound2 = 1.0 / jnp.sqrt(same_dim)
    # Stored as [in_features, out_features] (transpose of PyTorch layout).
    w1 = jax.random.uniform(k1, (in1, same_dim), dtype, -bound1, bound1)
    b1 = jax.random.uniform(k2, (1, same_dim), dtype, -bound1, bound1)
    w2 = jax.random.uniform(k3, (same_dim, same_dim), dtype, -bound2, bound2)
    b2 = jax.random.uniform(k4, (1, same_dim), dtype, -bound2, bound2)
    return w1, b1, w2, b2


def g_reason_ref(x, w1, b1, w2, b2):
    h = jnp.maximum(x @ w1 + b1, 0.0)
    return h @ w2 + b2


if __name__ == "__main__":
    same_dim = 32
    num_inputs = 2
    batch = 128

    key = jax.random.PRNGKey(0)
    kx, kp = jax.random.split(key)
    x = jax.random.normal(kx, (batch, same_dim * num_inputs), jnp.float32)
    w1, b1, w2, b2 = init_params(kp, same_dim, num_inputs)

    ref = g_reason_ref(x, w1, b1, w2, b2)

    # bf16 MXU path (weights cast ONCE, outside the per-call path).
    params_bf16 = prepare_params(w1, b1, w2, b2, jnp.bfloat16)
    out_bf16 = jax.block_until_ready(g_reason_forward(x, params_bf16, tile_b=64))
    assert out_bf16.shape == (batch, same_dim)
    assert jnp.allclose(out_bf16, ref, atol=3e-2, rtol=3e-2), \
        "bf16 path mismatch vs reference"

    # f32 compute path for strict numerical verification.
    params_f32 = prepare_params(w1, b1, w2, b2, jnp.float32)
    out_f32 = jax.block_until_ready(g_reason_forward(x, params_f32))
    assert out_f32.shape == (batch, same_dim)
    assert jnp.allclose(out_f32, ref, atol=1e-5, rtol=1e-5), \
        "f32 path mismatch vs reference"

    # NOTE: for many independent G_reason instances at this tiny size
    # (same_dim=32), batch them into a single call (stack along the batch
    # axis or block-diagonalize the weights) rather than one pallas_call per
    # instance — the per-call overhead dwarfs any in-kernel tuning.
    print("KERNEL_OK")
</pallas_src>

<mosaic_0001>
module attributes {stable_mosaic.version = 11 : i64} {
  func.func @g_reason_kernel(%arg0: i32, %arg1: memref<64x64xf32, #tpu.memory_space<vmem>>, %arg2: memref<64x32xbf16, #tpu.memory_space<vmem>>, %arg3: memref<1x32xf32, #tpu.memory_space<vmem>>, %arg4: memref<32x32xbf16, #tpu.memory_space<vmem>>, %arg5: memref<1x32xf32, #tpu.memory_space<vmem>>, %arg6: memref<64x32xf32, #tpu.memory_space<vmem>>) attributes {dimension_semantics = [#tpu.dimension_semantics<parallel>], iteration_bounds = array<i64: 2>, scalar_prefetch = 0 : i64, scratch_operands = 0 : i64, tpu.core_type = #tpu.core_type<tc>, window_params = [{transform_indices = @transform_0, window_bounds = array<i64: 64, 64>}, {pipeline_mode = #tpu.pipeline_mode<synchronous>, transform_indices = @transform_1, window_bounds = array<i64: 64, 32>}, {pipeline_mode = #tpu.pipeline_mode<synchronous>, transform_indices = @transform_2, window_bounds = array<i64: 1, 32>}, {pipeline_mode = #tpu.pipeline_mode<synchronous>, transform_indices = @transform_3, window_bounds = array<i64: 32, 32>}, {pipeline_mode = #tpu.pipeline_mode<synchronous>, transform_indices = @transform_4, window_bounds = array<i64: 1, 32>}, {transform_indices = @transform_5, window_bounds = array<i64: 64, 32>}]} {
    %c0 = arith.constant 0 : index
    %c0_0 = arith.constant 0 : index
    %0 = vector.load %arg1[%c0, %c0_0] : memref<64x64xf32, #tpu.memory_space<vmem>>, vector<64x64xf32>
    %1 = arith.truncf %0 : vector<64x64xf32> to vector<64x64xbf16>
    %c0_1 = arith.constant 0 : index
    %c0_2 = arith.constant 0 : index
    %2 = vector.load %arg2[%c0_1, %c0_2] : memref<64x32xbf16, #tpu.memory_space<vmem>>, vector<64x32xbf16>
    %cst = arith.constant dense<0.000000e+00> : vector<64x32xf32>
    %3 = tpu.matmul %1, %2, %cst {dimension_numbers = #tpu.dot_dimension_numbers<[1], [0], [0], [1], [0, 0, 1, 1], [], []>} : vector<64x64xbf16>, vector<64x32xbf16>, vector<64x32xf32> -> vector<64x32xf32>
    %c0_3 = arith.constant 0 : index
    %c0_4 = arith.constant 0 : index
    %4 = vector.load %arg3[%c0_3, %c0_4] : memref<1x32xf32, #tpu.memory_space<vmem>>, vector<1x32xf32>
    %5 = vector.broadcast %4 : vector<1x32xf32> to vector<64x32xf32>
    %6 = arith.addf %3, %5 : vector<64x32xf32>
    %cst_5 = arith.constant 0.000000e+00 : f32
    %7 = vector.broadcast %cst_5 : f32 to vector<64x32xf32>
    %8 = arith.maximumf %6, %7 : vector<64x32xf32>
    %9 = arith.truncf %8 : vector<64x32xf32> to vector<64x32xbf16>
    %c0_6 = arith.constant 0 : index
    %c0_7 = arith.constant 0 : index
    %10 = vector.load %arg4[%c0_6, %c0_7] : memref<32x32xbf16, #tpu.memory_space<vmem>>, vector<32x32xbf16>
    %cst_8 = arith.constant dense<0.000000e+00> : vector<64x32xf32>
    %11 = tpu.matmul %9, %10, %cst_8 {dimension_numbers = #tpu.dot_dimension_numbers<[1], [0], [0], [1], [0, 0, 1, 1], [], []>} : vector<64x32xbf16>, vector<32x32xbf16>, vector<64x32xf32> -> vector<64x32xf32>
    %c0_9 = arith.constant 0 : index
    %c0_10 = arith.constant 0 : index
    %12 = vector.load %arg5[%c0_9, %c0_10] : memref<1x32xf32, #tpu.memory_space<vmem>>, vector<1x32xf32>
    %13 = vector.broadcast %12 : vector<1x32xf32> to vector<64x32xf32>
    %14 = arith.addf %11, %13 : vector<64x32xf32>
    %c0_11 = arith.constant 0 : index
    %c0_12 = arith.constant 0 : index
    %15 = vector.load %arg6[%c0_11, %c0_12] : memref<64x32xf32, #tpu.memory_space<vmem>>, vector<64x32xf32>
    tpu.vector_store %arg6[%c0_11, %c0_12], %14 {strides = array<i32>} : memref<64x32xf32, #tpu.memory_space<vmem>>, vector<64x32xf32>,
    return
  }
  func.func @transform_0(%arg0: i32) -> (i32, i32) {
    %c0_i32 = arith.constant 0 : i32
    %c0_i32_0 = arith.constant 0 : i32
    return %arg0, %c0_i32 : i32, i32
  }
  func.func @transform_1(%arg0: i32) -> (i32, i32) {
    %c0_i32 = arith.constant 0 : i32
    %c0_i32_0 = arith.constant 0 : i32
    %c0_i32_1 = arith.constant 0 : i32
    return %c0_i32, %c0_i32_0 : i32, i32
  }
  func.func @transform_2(%arg0: i32) -> (i32, i32) {
    %c0_i32 = arith.constant 0 : i32
    %c0_i32_0 = arith.constant 0 : i32
    %c0_i32_1 = arith.constant 0 : i32
    return %c0_i32, %c0_i32_0 : i32, i32
  }
  func.func @transform_3(%arg0: i32) -> (i32, i32) {
    %c0_i32 = arith.constant 0 : i32
    %c0_i32_0 = arith.constant 0 : i32
    %c0_i32_1 = arith.constant 0 : i32
    return %c0_i32, %c0_i32_0 : i32, i32
  }
  func.func @transform_4(%arg0: i32) -> (i32, i32) {
    %c0_i32 = arith.constant 0 : i32
    %c0_i32_0 = arith.constant 0 : i32
    %c0_i32_1 = arith.constant 0 : i32
    return %c0_i32, %c0_i32_0 : i32, i32
  }
  func.func @transform_5(%arg0: i32) -> (i32, i32) {
    %c0_i32 = arith.constant 0 : i32
    %c0_i32_0 = arith.constant 0 : i32
    return %arg0, %c0_i32 : i32, i32
  }
}

module attributes {stable_mosaic.version = 11 : i64} {
  func.func @g_reason_kernel(%arg0: i32, %arg1: memref<64x64xf32, #tpu.memory_space<vmem>>, %arg2: memref<64x32xbf16, #tpu.memory_space<vmem>>, %arg3: memref<1x32xf32, #tpu.memory_space<vmem>>, %arg4: memref<32x32xbf16, #tpu.memory_space<vmem>>, %arg5: memref<1x32xf32, #tpu.memory_space<vmem>>, %arg6: memref<64x32xf32, #tpu.memory_space<vmem>>) attributes {dimension_semantics = [#tpu.dimension_semantics<parallel>], iteration_bounds = array<i64: 2>, scalar_prefetch = 0 : i64, scratch_operands = 0 : i64, tpu.core_type = #tpu.core_type<tc>, window_params = [{transform_indices = @transform_0, window_bounds = array<i64: 64, 64>}, {pipeline_mode = #tpu.pipeline_mode<synchronous>, transform_indices = @transform_1, window_bounds = array<i64: 64, 32>}, {pipeline_mode = #tpu.pipeline_mode<synchronous>, transform_indices = @transform_2, window_bounds = array<i64: 1, 32>}, {pipeline_mode = #tpu.pipeline_mode<synchronous>, transform_indices = @transform_3, window_bounds = array<i64: 32, 32>}, {pipeline_mode = #tpu.pipeline_mode<synchronous>, transform_indices = @transform_4, window_bounds = array<i64: 1, 32>}, {transform_indices = @transform_5, window_bounds = array<i64: 64, 32>}]} {
    %c0 = arith.constant 0 : index
    %c0_0 = arith.constant 0 : index
    %0 = vector.load %arg1[%c0, %c0_0] : memref<64x64xf32, #tpu.memory_space<vmem>>, vector<64x64xf32>
    %1 = arith.truncf %0 : vector<64x64xf32> to vector<64x64xbf16>
    %c0_1 = arith.constant 0 : index
    %c0_2 = arith.constant 0 : index
    %2 = vector.load %arg2[%c0_1, %c0_2] : memref<64x32xbf16, #tpu.memory_space<vmem>>, vector<64x32xbf16>
    %cst = arith.constant dense<0.000000e+00> : vector<64x32xf32>
    %3 = tpu.matmul %1, %2, %cst {dimension_numbers = #tpu.dot_dimension_numbers<[1], [0], [0], [1], [0, 0, 1, 1], [], []>} : vector<64x64xbf16>, vector<64x32xbf16>, vector<64x32xf32> -> vector<64x32xf32>
    %c0_3 = arith.constant 0 : index
    %c0_4 = arith.constant 0 : index
    %4 = vector.load %arg3[%c0_3, %c0_4] : memref<1x32xf32, #tpu.memory_space<vmem>>, vector<1x32xf32>
    %5 = vector.broadcast %4 : vector<1x32xf32> to vector<64x32xf32>
    %6 = arith.addf %3, %5 : vector<64x32xf32>
    %cst_5 = arith.constant 0.000000e+00 : f32
    %7 = vector.broadcast %cst_5 : f32 to vector<64x32xf32>
    %8 = arith.maximumf %6, %7 : vector<64x32xf32>
    %9 = arith.truncf %8 : vector<64x32xf32> to vector<64x32xbf16>
    %c0_6 = arith.constant 0 : index
    %c0_7 = arith.constant 0 : index
    %10 = vector.load %arg4[%c0_6, %c0_7] : memref<32x32xbf16, #tpu.memory_space<vmem>>, vector<32x32xbf16>
    %cst_8 = arith.constant dense<0.000000e+00> : vector<64x32xf32>
    %11 = tpu.matmul %9, %10, %cst_8 {dimension_numbers = #tpu.dot_dimension_numbers<[1], [0], [0], [1], [0, 0, 1, 1], [], []>} : vector<64x32xbf16>, vector<32x32xbf16>, vector<64x32xf32> -> vector<64x32xf32>
    %c0_9 = arith.constant 0 : index
    %c0_10 = arith.constant 0 : index
    %12 = vector.load %arg5[%c0_9, %c0_10] : memref<1x32xf32, #tpu.memory_space<vmem>>, vector<1x32xf32>
    %13 = vector.broadcast %12 : vector<1x32xf32> to vector<64x32xf32>
    %14 = arith.addf %11, %13 : vector<64x32xf32>
    %c0_11 = arith.constant 0 : index
    %c0_12 = arith.constant 0 : index
    %15 = vector.load %arg6[%c0_11, %c0_12] : memref<64x32xf32, #tpu.memory_space<vmem>>, vector<64x32xf32>
    tpu.vector_store %arg6[%c0_11, %c0_12], %14 {strides = array<i32>} : memref<64x32xf32, #tpu.memory_space<vmem>>, vector<64x32xf32>,
    return
  }
  func.func @transform_0(%arg0: i32) -> (i32, i32) {
    %c0_i32 = arith.constant 0 : i32
    %c0_i32_0 = arith.constant 0 : i32
    return %arg0, %c0_i32 : i32, i32
  }
  func.func @transform_1(%arg0: i32) -> (i32, i32) {
    %c0_i32 = arith.constant 0 : i32
    %c0_i32_0 = arith.constant 0 : i32
    %c0_i32_1 = arith.constant 0 : i32
    return %c0_i32, %c0_i32_0 : i32, i32
  }
  func.func @transform_2(%arg0: i32) -> (i32, i32) {
    %c0_i32 = arith.constant 0 : i32
    %c0_i32_0 = arith.constant 0 : i32
    %c0_i32_1 = arith.constant 0 : i32
    return %c0_i32, %c0_i32_0 : i32, i32
  }
  func.func @transform_3(%arg0: i32) -> (i32, i32) {
    %c0_i32 = arith.constant 0 : i32
    %c0_i32_0 = arith.constant 0 : i32
    %c0_i32_1 = arith.constant 0 : i32
    return %c0_i32, %c0_i32_0 : i32, i32
  }
  func.func @transform_4(%arg0: i32) -> (i32, i32) {
    %c0_i32 = arith.constant 0 : i32
    %c0_i32_0 = arith.constant 0 : i32
    %c0_i32_1 = arith.constant 0 : i32
    return %c0_i32, %c0_i32_0 : i32, i32
  }
  func.func @transform_5(%arg0: i32) -> (i32, i32) {
    %c0_i32 = arith.constant 0 : i32
    %c0_i32_0 = arith.constant 0 : i32
    return %arg0, %c0_i32 : i32, i32
  }
}

</mosaic_0001>

<bundles_post_ra>
// kernel: tpu_custom_call.1
= control target key start
LH: loop header
LB: loop body
LE: loop exit
PB: predicated region body
PF: predicated region fallthrough
CT: control target
= control target key end

     0   :  { %s656_s18 = smov 0   ;;  %s720_s0 = inlined_call_operand.vmem [shape: f32[128,64], index: 0, kind: input, shape index: {}]   ;;  %s721_s1 = inlined_call_operand.vmem [shape: bf16[64,32], index: 1, kind: input, shape index: {}]   ;;  %s722_s2 = inlined_call_operand.vmem [shape: f32[1,32], index: 2, kind: input, shape index: {}]   ;;  %s723_s3 = inlined_call_operand.vmem [shape: bf16[32,32], index: 3, kind: input, shape index: {}]   ;;  %s724_s4 = inlined_call_operand.vmem [shape: f32[1,32], index: 4, kind: input, shape index: {}]   ;;  %s725_s5 = inlined_call_operand.vmem [shape: f32[128,32], index: 5, kind: output, shape index: {}]  }
   0x1 LB: > { %s535_s19 = sadd.s32 4294967295, %s624_s18   ;;  %p539_p0 = scmp.ge.s32.totalorder %s624_s18, 1  ;;  %s624_s18 = sphi %s656_s18, %s15_s18  }
   0x2   : > { %p188_p1 = scmp.lt.s32.totalorder %s624_s18, 3 }
   0x4   : > { %p189_p2 = pnand %p539_p0, %p188_p1 }
   0x5   : > { %v612_v0 = vld [vmem:[%s721_s1] sm:$0xff] (!%p189_p2)   ;;  %s540_s22 = sshll.u32 (!%p189_p2), %s535_s19, 3  ;;  %v613_v1 = vld [vmem:[%s721_s1 + $0x8] sm:$0xff] (!%p189_p2)   ;;  %v614_v2 = vld [vmem:[%s721_s1 + $0x10] sm:$0xff] (!%p189_p2)   ;;  %vm280_vm0 = vcmask (!%p189_p2), 523264   ;;  %vm393_vm1 = vcmask (!%p189_p2), 261120  }
   0x6   : > { %192 = sbr.rel (%p189_p2) target bundleno = 470 (0x1d6), region = 40  ;;  %p217_p3 = scmp.lt.s32.totalorder (!%p189_p2), %s540_s22, 15  ;;  %576 = vmatprep.subr.bf16.mxu0 (!%p189_p2), %v612_v0  ;;  %v615_v5 = vld [vmem:[%s721_s1 + $0x18] sm:$0xff] (!%p189_p2)   ;;  %v616_v16 = vld [vmem:[%s723_s3] sm:$0xff] (!%p189_p2)   ;;  %v617_v17 = vld [vmem:[%s723_s3 + $0x8] sm:$0xff] (!%p189_p2)  }
   0x7   : > { %577 = vmatpush3.bf16.msra.mxu0 (!%p189_p2), %v612_v0  ;;  %592 = vmatprep.subr.bf16.mxu1 (!%p189_p2), %v616_v16  ;;  %v544_v18 = vld [vmem:[%s722_s2] ss:$0 sm:$0xff] (!%p189_p2) }
   0x8   : > { %578 = vmatprep.subr.bf16.mxu0 (!%p189_p2), %v613_v1  ;;  %593 = vmatpush3.bf16.msra.mxu1 (!%p189_p2), %v616_v16  ;;  %v553_v47 = vld [vmem:[%s724_s4] ss:$0 sm:$0xff] (!%p189_p2) }
   0x9   : > { %594 = vmatprep.subr.bf16.mxu1 (!%p189_p2), %v617_v17 }
   0xb   : > { %579 = vmatpush3.bf16.msra.mxu0 (!%p189_p2), %v613_v1 }
   0xc   : > { %580 = vmatprep.subr.bf16.mxu0 (!%p189_p2), %v614_v2  ;;  %595 = vmatpush3.bf16.msra.mxu1 (!%p189_p2), %v617_v17 }
   0xd   : > { %s727_s22 = smov (!%p217_p3, %s540_s22), 15 }
   0xe   : > { %s541_s27 = sshll.u32 %s727_s22, 3 }
   0xf   : > { %s220_s30 = scalar_lea.vmem %s720_s0, %s541_s27  ;;  %581 = vmatpush3.bf16.msra.mxu0 %v614_v2  ;;  %s226_s19 = scalar_lea.vmem %s725_s5, %s541_s27 }
  0x10   : > { %v229_v3 = vld [vmem:[%s220_s30] sm:$0xff]  ;;  %v230_v4 = vld [vmem:[%s220_s30 + $0x8] sm:$0xff]  ;;  %v231_v7 = vld [vmem:[%s220_s30 + $0x10] sm:$0xff]  ;;  %582 = vmatprep.subr.bf16.mxu0 %v615_v5 }
  0x11   : > { %v237_v6 = vpack.c.bf16 %v230_v4, %v229_v3  ;;  %v232_v8 = vld [vmem:[%s220_s30 + $0x18] sm:$0xff]  ;;  %v233_v9 = vld [vmem:[%s220_s30 + $0x20] sm:$0xff]  ;;  %v234_v10 = vld [vmem:[%s220_s30 + $0x28] sm:$0xff] }
  0x12   : > { %v238_v11 = vpack.c.bf16 %v232_v8, %v231_v7  ;;  %v239_v12 = vpack.c.bf16 %v234_v10, %v233_v9  ;;  %v235_v13 = vld [vmem:[%s220_s30 + $0x30] sm:$0xff]  ;;  %v236_v14 = vld [vmem:[%s220_s30 + $0x38] sm:$0xff] }
  0x13   : > { %584 = vmatprep.mubr.msk.bf16.mxu0 %vm280_vm0, %v237_v6  ;;  %583 = vmatpush3.bf16.msra.mxu0 %v615_v5  ;;  %v240_v15 = vpack.c.bf16 %v236_v14, %v235_v13 }
  0x16   : > { %585 = vmatmul.mubr.msk.bf16.vlgmr.msra.gmra.mrb[0].mxu0 %vm280_vm0, %v238_v11 }
  0x17   : > { %588 = vmatprep.mubr.msk.bf16.mxu0 %vm280_vm0, %v239_v12 }
  0x1e   : > { %589 = vmatmul.mubr.msk.bf16.gmra.mrb[4].mxu0 %vm280_vm0, %v240_v15 }
  0xe9   : > { %v586_v19 = vpop.f32.mrb[0].mxu0 }
  0xea   : > { %v336_v20 = vadd.f32 %v586_v19, %v544_v18  ;;  %v327_v21 = vpop.f32.mrb[1].mxu0 }
  0xeb   : > { %v328_v22 = vadd.f32 %v544_v18, %v327_v21  ;;  %v587_v23 = vpop.f32.mrb[2].mxu0 }
  0xec   : > { %v339_v24 = vadd.f32 %v587_v23, %v544_v18  ;;  %v330_v25 = vpop.f32.mrb[3].mxu0  ;;  %v360_v27 = vmax.f32 %v336_v20, 0.0 }
  0xed   : > { %v331_v26 = vadd.f32 %v544_v18, %v330_v25  ;;  %v358_v29 = vmax.f32 %v328_v22, 0.0 }
  0xee   : > { %v361_v28 = vmax.f32 %v339_v24, 0.0 }
  0xef   : > { %v359_v30 = vmax.f32 %v331_v26, 0.0 }
  0xf0   : > { %v367_v31 = vpack.c.bf16 %v361_v28, %v360_v27 }
  0xf1   : > { %v590_v32 = vpop.f32.mrb[4].mxu0  ;;  %v366_v33 = vpack.c.bf16 %v359_v30, %v358_v29 }
  0xf2   : > { %v352_v34 = vadd.f32 %v590_v32, %v544_v18  ;;  %v343_v35 = vpop.f32.mrb[5].mxu0 }
  0xf3   : > { %v344_v36 = vadd.f32 %v544_v18, %v343_v35  ;;  %v591_v37 = vpop.f32.mrb[6].mxu0  ;;  %596 = vmatprep.mubr.msk.bf16.mxu1 %vm393_vm1, %v366_v33 }
  0xf4   : > { %v355_v38 = vadd.f32 %v591_v37, %v544_v18  ;;  %v346_v39 = vpop.f32.mrb[7].mxu0  ;;  %597 = vmatmul.mubr.msk.bf16.vlgmr.msra.gmra.mrb[0].mxu1 %vm393_vm1, %v367_v31  ;;  %v364_v41 = vmax.f32 %v352_v34, 0.0 }
  0xf5   : > { %v347_v40 = vadd.f32 %v544_v18, %v346_v39  ;;  %v362_v43 = vmax.f32 %v344_v36, 0.0 }
  0xf6   : > { %v365_v42 = vmax.f32 %v355_v38, 0.0 }
  0xf7   : > { %v363_v44 = vmax.f32 %v347_v40, 0.0 }
  0xf8   : > { %v369_v45 = vpack.c.bf16 %v365_v42, %v364_v41 }
  0xf9   : > { %v368_v46 = vpack.c.bf16 %v363_v44, %v362_v43 }
  0xfb   : > { %600 = vmatprep.mubr.msk.bf16.mxu1 %vm393_vm1, %v368_v46 }
  0xfc   : > { %601 = vmatmul.mubr.msk.bf16.gmra.mrb[4].mxu1 %vm393_vm1, %v369_v45 }
 0x1c7   : > { %v598_v48 = vpop.f32.mrb[0].mxu1 }
 0x1c8   : > { %v449_v49 = vadd.f32 %v598_v48, %v553_v47  ;;  %v440_v50 = vpop.f32.mrb[1].mxu1 }
 0x1c9   : > { %v441_v51 = vadd.f32 %v553_v47, %v440_v50  ;;  %v599_v52 = vpop.f32.mrb[2].mxu1 }
 0x1ca   : > { %473 = vst.msk [vmem:[%s226_s19 + $0x10] sm:$0xff] %vm393_vm1, %v449_v49  ;;  %v452_v53 = vadd.f32 %v599_v52, %v553_v47  ;;  %v443_v54 = vpop.f32.mrb[3].mxu1 }
 0x1cb   : > { %471 = vst.msk [vmem:[%s226_s19] sm:$0xff] %vm393_vm1, %v441_v51  ;;  %v444_v55 = vadd.f32 %v553_v47, %v443_v54 }
 0x1cc   : > { %474 = vst.msk [vmem:[%s226_s19 + $0x18] sm:$0xff] %vm393_vm1, %v452_v53 }
 0x1cd   : > { %472 = vst.msk [vmem:[%s226_s19 + $0x8] sm:$0xff] %vm393_vm1, %v444_v55 }
 0x1cf   : > { %v602_v56 = vpop.f32.mrb[4].mxu1 }
 0x1d0   : > { %v465_v57 = vadd.f32 %v602_v56, %v553_v47  ;;  %v456_v58 = vpop.f32.mrb[5].mxu1 }
 0x1d1   : > { %v457_v59 = vadd.f32 %v553_v47, %v456_v58  ;;  %v603_v60 = vpop.f32.mrb[6].mxu1 }
 0x1d2   : > { %477 = vst.msk [vmem:[%s226_s19 + $0x30] sm:$0xff] %vm393_vm1, %v465_v57  ;;  %v468_v61 = vadd.f32 %v603_v60, %v553_v47  ;;  %v459_v62 = vpop.f32.mrb[7].mxu1 }
 0x1d3   : > { %475 = vst.msk [vmem:[%s226_s19 + $0x20] sm:$0xff] %vm393_vm1, %v457_v59  ;;  %v460_v63 = vadd.f32 %v553_v47, %v459_v62 }
 0x1d4   : > { %478 = vst.msk [vmem:[%s226_s19 + $0x38] sm:$0xff] %vm393_vm1, %v468_v61 }
 0x1d5   : > { %476 = vst.msk [vmem:[%s226_s19 + $0x28] sm:$0xff] %vm393_vm1, %v460_v63 }
 0x1d6 PF: > { %s15_s18 = sadd.s32 1, %s624_s18  }
 0x1d7   : > { %p12_p4 = scmp.ge.s32.totalorder %s15_s18, 4  }
 0x1d9   :  { %14 = sbr.rel (!%p12_p4) target bundleno = 1 (0x1), region = 70 }

// kernel: tpu_custom_call.1
= control target key start
LH: loop header
LB: loop body
LE: loop exit
PB: predicated region body
PF: predicated region fallthrough
CT: control target
= control target key end

     0   :  { %s656_s18 = smov 0   ;;  %s720_s0 = inlined_call_operand.vmem [shape: f32[128,64], index: 0, kind: input, shape index: {}]   ;;  %s721_s1 = inlined_call_operand.vmem [shape: bf16[64,32], index: 1, kind: input, shape index: {}]   ;;  %s722_s2 = inlined_call_operand.vmem [shape: f32[1,32], index: 2, kind: input, shape index: {}]   ;;  %s723_s3 = inlined_call_operand.vmem [shape: bf16[32,32], index: 3, kind: input, shape index: {}]   ;;  %s724_s4 = inlined_call_operand.vmem [shape: f32[1,32], index: 4, kind: input, shape index: {}]   ;;  %s725_s5 = inlined_call_operand.vmem [shape: f32[128,32], index: 5, kind: output, shape index: {}]  }
   0x1 LB: > { %s535_s19 = sadd.s32 4294967295, %s624_s18   ;;  %p539_p0 = scmp.ge.s32.totalorder %s624_s18, 1  ;;  %s624_s18 = sphi %s656_s18, %s15_s18  }
   0x2   : > { %p188_p1 = scmp.lt.s32.totalorder %s624_s18, 3 }
   0x4   : > { %p189_p2 = pnand %p539_p0, %p188_p1 }
   0x5   : > { %v612_v0 = vld [vmem:[%s721_s1] sm:$0xff] (!%p189_p2)   ;;  %s540_s22 = sshll.u32 (!%p189_p2), %s535_s19, 3  ;;  %v613_v1 = vld [vmem:[%s721_s1 + $0x8] sm:$0xff] (!%p189_p2)   ;;  %v614_v2 = vld [vmem:[%s721_s1 + $0x10] sm:$0xff] (!%p189_p2)   ;;  %vm280_vm0 = vcmask (!%p189_p2), 523264   ;;  %vm393_vm1 = vcmask (!%p189_p2), 261120  }
   0x6   : > { %192 = sbr.rel (%p189_p2) target bundleno = 470 (0x1d6), region = 40  ;;  %p217_p3 = scmp.lt.s32.totalorder (!%p189_p2), %s540_s22, 15  ;;  %576 = vmatprep.subr.bf16.mxu0 (!%p189_p2), %v612_v0  ;;  %v615_v5 = vld [vmem:[%s721_s1 + $0x18] sm:$0xff] (!%p189_p2)   ;;  %v616_v16 = vld [vmem:[%s723_s3] sm:$0xff] (!%p189_p2)   ;;  %v617_v17 = vld [vmem:[%s723_s3 + $0x8] sm:$0xff] (!%p189_p2)  }
   0x7   : > { %577 = vmatpush3.bf16.msra.mxu0 (!%p189_p2), %v612_v0  ;;  %592 = vmatprep.subr.bf16.mxu1 (!%p189_p2), %v616_v16  ;;  %v544_v18 = vld [vmem:[%s722_s2] ss:$0 sm:$0xff] (!%p189_p2) }
   0x8   : > { %578 = vmatprep.subr.bf16.mxu0 (!%p189_p2), %v613_v1  ;;  %593 = vmatpush3.bf16.msra.mxu1 (!%p189_p2), %v616_v16  ;;  %v553_v47 = vld [vmem:[%s724_s4] ss:$0 sm:$0xff] (!%p189_p2) }
   0x9   : > { %594 = vmatprep.subr.bf16.mxu1 (!%p189_p2), %v617_v17 }
   0xb   : > { %579 = vmatpush3.bf16.msra.mxu0 (!%p189_p2), %v613_v1 }
   0xc   : > { %580 = vmatprep.subr.bf16.mxu0 (!%p189_p2), %v614_v2  ;;  %595 = vmatpush3.bf16.msra.mxu1 (!%p189_p2), %v617_v17 }
   0xd   : > { %s727_s22 = smov (!%p217_p3, %s540_s22), 15 }
   0xe   : > { %s541_s27 = sshll.u32 %s727_s22, 3 }
   0xf   : > { %s220_s30 = scalar_lea.vmem %s720_s0, %s541_s27  ;;  %581 = vmatpush3.bf16.msra.mxu0 %v614_v2  ;;  %s226_s19 = scalar_lea.vmem %s725_s5, %s541_s27 }
  0x10   : > { %v229_v3 = vld [vmem:[%s220_s30] sm:$0xff]  ;;  %v230_v4 = vld [vmem:[%s220_s30 + $0x8] sm:$0xff]  ;;  %v231_v7 = vld [vmem:[%s220_s30 + $0x10] sm:$0xff]  ;;  %582 = vmatprep.subr.bf16.mxu0 %v615_v5 }
  0x11   : > { %v237_v6 = vpack.c.bf16 %v230_v4, %v229_v3  ;;  %v232_v8 = vld [vmem:[%s220_s30 + $0x18] sm:$0xff]  ;;  %v233_v9 = vld [vmem:[%s220_s30 + $0x20] sm:$0xff]  ;;  %v234_v10 = vld [vmem:[%s220_s30 + $0x28] sm:$0xff] }
  0x12   : > { %v238_v11 = vpack.c.bf16 %v232_v8, %v231_v7  ;;  %v239_v12 = vpack.c.bf16 %v234_v10, %v233_v9  ;;  %v235_v13 = vld [vmem:[%s220_s30 + $0x30] sm:$0xff]  ;;  %v236_v14 = vld [vmem:[%s220_s30 + $0x38] sm:$0xff] }
  0x13   : > { %584 = vmatprep.mubr.msk.bf16.mxu0 %vm280_vm0, %v237_v6  ;;  %583 = vmatpush3.bf16.msra.mxu0 %v615_v5  ;;  %v240_v15 = vpack.c.bf16 %v236_v14, %v235_v13 }
  0x16   : > { %585 = vmatmul.mubr.msk.bf16.vlgmr.msra.gmra.mrb[0].mxu0 %vm280_vm0, %v238_v11 }
  0x17   : > { %588 = vmatprep.mubr.msk.bf16.mxu0 %vm280_vm0, %v239_v12 }
  0x1e   : > { %589 = vmatmul.mubr.msk.bf16.gmra.mrb[4].mxu0 %vm280_vm0, %v240_v15 }
  0xe9   : > { %v586_v19 = vpop.f32.mrb[0].mxu0 }
  0xea   : > { %v336_v20 = vadd.f32 %v586_v19, %v544_v18  ;;  %v327_v21 = vpop.f32.mrb[1].mxu0 }
  0xeb   : > { %v328_v22 = vadd.f32 %v544_v18, %v327_v21  ;;  %v587_v23 = vpop.f32.mrb[2].mxu0 }
  0xec   : > { %v339_v24 = vadd.f32 %v587_v23, %v544_v18  ;;  %v330_v25 = vpop.f32.mrb[3].mxu0  ;;  %v360_v27 = vmax.f32 %v336_v20, 0.0 }
  0xed   : > { %v331_v26 = vadd.f32 %v544_v18, %v330_v25  ;;  %v358_v29 = vmax.f32 %v328_v22, 0.0 }
  0xee   : > { %v361_v28 = vmax.f32 %v339_v24, 0.0 }
  0xef   : > { %v359_v30 = vmax.f32 %v331_v26, 0.0 }
  0xf0   : > { %v367_v31 = vpack.c.bf16 %v361_v28, %v360_v27 }
  0xf1   : > { %v590_v32 = vpop.f32.mrb[4].mxu0  ;;  %v366_v33 = vpack.c.bf16 %v359_v30, %v358_v29 }
  0xf2   : > { %v352_v34 = vadd.f32 %v590_v32, %v544_v18  ;;  %v343_v35 = vpop.f32.mrb[5].mxu0 }
  0xf3   : > { %v344_v36 = vadd.f32 %v544_v18, %v343_v35  ;;  %v591_v37 = vpop.f32.mrb[6].mxu0  ;;  %596 = vmatprep.mubr.msk.bf16.mxu1 %vm393_vm1, %v366_v33 }
  0xf4   : > { %v355_v38 = vadd.f32 %v591_v37, %v544_v18  ;;  %v346_v39 = vpop.f32.mrb[7].mxu0  ;;  %597 = vmatmul.mubr.msk.bf16.vlgmr.msra.gmra.mrb[0].mxu1 %vm393_vm1, %v367_v31  ;;  %v364_v41 = vmax.f32 %v352_v34, 0.0 }
  0xf5   : > { %v347_v40 = vadd.f32 %v544_v18, %v346_v39  ;;  %v362_v43 = vmax.f32 %v344_v36, 0.0 }
  0xf6   : > { %v365_v42 = vmax.f32 %v355_v38, 0.0 }
  0xf7   : > { %v363_v44 = vmax.f32 %v347_v40, 0.0 }
  0xf8   : > { %v369_v45 = vpack.c.bf16 %v365_v42, %v364_v41 }
  0xf9   : > { %v368_v46 = vpack.c.bf16 %v363_v44, %v362_v43 }
  0xfb   : > { %600 = vmatprep.mubr.msk.bf16.mxu1 %vm393_vm1, %v368_v46 }
  0xfc   : > { %601 = vmatmul.mubr.msk.bf16.gmra.mrb[4].mxu1 %vm393_vm1, %v369_v45 }
 0x1c7   : > { %v598_v48 = vpop.f32.mrb[0].mxu1 }
 0x1c8   : > { %v449_v49 = vadd.f32 %v598_v48, %v553_v47  ;;  %v440_v50 = vpop.f32.mrb[1].mxu1 }
 0x1c9   : > { %v441_v51 = vadd.f32 %v553_v47, %v440_v50  ;;  %v599_v52 = vpop.f32.mrb[2].mxu1 }
 0x1ca   : > { %473 = vst.msk [vmem:[%s226_s19 + $0x10] sm:$0xff] %vm393_vm1, %v449_v49  ;;  %v452_v53 = vadd.f32 %v599_v52, %v553_v47  ;;  %v443_v54 = vpop.f32.mrb[3].mxu1 }
 0x1cb   : > { %471 = vst.msk [vmem:[%s226_s19] sm:$0xff] %vm393_vm1, %v441_v51  ;;  %v444_v55 = vadd.f32 %v553_v47, %v443_v54 }
 0x1cc   : > { %474 = vst.msk [vmem:[%s226_s19 + $0x18] sm:$0xff] %vm393_vm1, %v452_v53 }
 0x1cd   : > { %472 = vst.msk [vmem:[%s226_s19 + $0x8] sm:$0xff] %vm393_vm1, %v444_v55 }
 0x1cf   : > { %v602_v56 = vpop.f32.mrb[4].mxu1 }
 0x1d0   : > { %v465_v57 = vadd.f32 %v602_v56, %v553_v47  ;;  %v456_v58 = vpop.f32.mrb[5].mxu1 }
 0x1d1   : > { %v457_v59 = vadd.f32 %v553_v47, %v456_v58  ;;  %v603_v60 = vpop.f32.mrb[6].mxu1 }
 0x1d2   : > { %477 = vst.msk [vmem:[%s226_s19 + $0x30] sm:$0xff] %vm393_vm1, %v465_v57  ;;  %v468_v61 = vadd.f32 %v603_v60, %v553_v47  ;;  %v459_v62 = vpop.f32.mrb[7].mxu1 }
 0x1d3   : > { %475 = vst.msk [vmem:[%s226_s19 + $0x20] sm:$0xff] %vm393_vm1, %v457_v59  ;;  %v460_v63 = vadd.f32 %v553_v47, %v459_v62 }
 0x1d4   : > { %478 = vst.msk [vmem:[%s226_s19 + $0x38] sm:$0xff] %vm393_vm1, %v468_v61 }
 0x1d5   : > { %476 = vst.msk [vmem:[%s226_s19 + $0x28] sm:$0xff] %vm393_vm1, %v460_v63 }
 0x1d6 PF: > { %s15_s18 = sadd.s32 1, %s624_s18  }
 0x1d7   : > { %p12_p4 = scmp.ge.s32.totalorder %s15_s18, 4  }
 0x1d9   :  { %14 = sbr.rel (!%p12_p4) target bundleno = 1 (0x1), region = 70 }

</bundles_post_ra>
